<compile_context>
chip_gen: v7x
topology: tpu7x:2x2x1
jax: 0.10.0
libtpu: 0.0.40
codegen_flags: <defaults>
</compile_context>

<pallas_src>
import numpy as np
import jax
import jax.numpy as jnp
from jax import lax
from jax.experimental import pallas as pl
from jax.experimental.pallas import tpu as pltpu


STAGE_CHANNELS = (8, 16, 32)      # out_dims of the synthetic backbone
COMPUTE_DTYPE = jnp.bfloat16      # MXU operand dtype (f32 accumulation)


# ---------------------------------------------------------------------------
# Fused kernel: one grid step = one image through all 3 stages, both branches.
#   xp_ref : (H+2, W*Cin)      f32  H-padded NHWC input rows (W pad is in weights)
#   wS_ref : (3, K_S, 128)     bf16 Toeplitz tap matrices (both branches in N)
#   bS_ref : (1, 128)          f32  bias tiled over Wo, both branches
#   oS_ref : (Ho_S, 128)       f32  [teacher Wo*C | student Wo*C] per row
#   bufS   : VMEM scratch      f32  next-stage input (row 0 = zero H-pad)
# Output row ho needs padded rows {2ho, 2ho+1, 2ho+2}: 3 sublane-strided reads,
# one accumulating MXU dot per ky tap.
# ---------------------------------------------------------------------------
def _stfpm_kernel(xp_ref, w1_ref, b1_ref, w2_ref, b2_ref, w3_ref, b3_ref,
                  o1_ref, o2_ref, o3_ref, buf2_ref, buf3_ref):
    def conv3x3_s2(src_ref, h_out, w_ref, b_ref):
        r0 = src_ref[pl.ds(0, h_out, stride=2), :].astype(COMPUTE_DTYPE)
        r1 = src_ref[pl.ds(1, h_out, stride=2), :].astype(COMPUTE_DTYPE)
        r2 = src_ref[pl.ds(2, h_out, stride=2), :].astype(COMPUTE_DTYPE)
        acc = jnp.dot(r0, w_ref[0], preferred_element_type=jnp.float32)
        acc += jnp.dot(r1, w_ref[1], preferred_element_type=jnp.float32)
        acc += jnp.dot(r2, w_ref[2], preferred_element_type=jnp.float32)
        return jnp.maximum(acc + b_ref[...], 0.0)          # bias + ReLU in f32

    # Stage 1: teacher & student share the input; weights concatenated along N.
    y1 = conv3x3_s2(xp_ref, o1_ref.shape[0], w1_ref, b1_ref)
    o1_ref[...] = y1.astype(o1_ref.dtype)
    buf2_ref[pl.ds(0, 1), :] = jnp.zeros((1, buf2_ref.shape[1]), buf2_ref.dtype)
    buf2_ref[pl.ds(1, y1.shape[0]), :] = y1.astype(buf2_ref.dtype)

    # Stages 2-3: branch-block-diagonal weights keep both branches in one dot.
    y2 = conv3x3_s2(buf2_ref, o2_ref.shape[0], w2_ref, b2_ref)
    o2_ref[...] = y2.astype(o2_ref.dtype)
    buf3_ref[pl.ds(0, 1), :] = jnp.zeros((1, buf3_ref.shape[1]), buf3_ref.dtype)
    buf3_ref[pl.ds(1, y2.shape[0]), :] = y2.astype(buf3_ref.dtype)

    y3 = conv3x3_s2(buf3_ref, o3_ref.shape[0], w3_ref, b3_ref)
    o3_ref[...] = y3.astype(o3_ref.dtype)


# ---------------------------------------------------------------------------
# Parameters: raw conv params + one-time host-side packing into kernel layout.
# ---------------------------------------------------------------------------
def init_backbone_params(key, in_channels=3):
    """Deterministic parameters for one 3-stage backbone."""
    params = []
    cin = in_channels
    for cout in STAGE_CHANNELS:
        key, kw, kb = jax.random.split(key, 3)
        fan_in = 9 * cin
        wt = jax.random.normal(kw, (3, 3, cin, cout), jnp.float32) / jnp.sqrt(fan_in)
        bias = 0.01 * jax.random.normal(kb, (cout,), jnp.float32)
        params.append((wt, bias))
        cin = cout
    return params


def _fold_taps(w, w_in, w_out):
    """(3,3,Cin,Cout) -> 3 Toeplitz tap matrices (W_in*Cin, W_out*Cout).

    Tap ky maps padded input row 2*ho+ky to output row ho.  The kx taps, the
    stride-2 column subsampling AND the zero W-padding (absent rows) are folded
    in: T[wi*Cin+ci, wo*Cout+co] = w[ky,kx,ci,co] with wi = 2*wo+kx-1 if valid.
    """
    _, _, c_in, c_out = w.shape
    taps = []
    for ky in range(3):
        m = np.zeros((w_in, c_in, w_out, c_out), np.float32)
        for kx in range(3):
            for wo in range(w_out):
                wi = 2 * wo + kx - 1
                if 0 <= wi < w_in:
                    m[wi, :, wo, :] += w[ky, kx]
        taps.append(m.reshape(w_in * c_in, w_out * c_out))
    return np.stack(taps, axis=0)


def pack_stfpm_params(teacher_params, student_params, image_hw):
    """Fold both backbones' conv weights into the fused-kernel layout (once)."""
    h, w = image_hw
    assert h % 8 == 0 and w % 8 == 0, "3 stride-2 stages need H, W divisible by 8"
    packed = []
    for stage, ((tw, tb), (sw, sb)) in enumerate(zip(teacher_params, student_params)):
        c_out = tw.shape[-1]
        w_out = w // 2
        n = w_out * c_out
        t_taps = _fold_taps(np.asarray(tw), w, w_out)      # (3, W*Cin, n)
        s_taps = _fold_taps(np.asarray(sw), w, w_out)
        if stage == 0:                                     # shared input: concat along N
            w_both = np.concatenate([t_taps, s_taps], axis=2)
        else:                                              # block-diagonal per branch
            k = t_taps.shape[1]
            w_both = np.zeros((3, 2 * k, 2 * n), np.float32)
            w_both[:, :k, :n] = t_taps
            w_both[:, k:, n:] = s_taps
        b_both = np.concatenate([np.tile(np.asarray(tb), w_out),
                                 np.tile(np.asarray(sb), w_out)])[None, :]   # (1, 2n)
        packed.append((jnp.asarray(w_both, dtype=COMPUTE_DTYPE),
                       jnp.asarray(b_both, dtype=jnp.float32)))
        h, w = h // 2, w_out
    return tuple(packed)


# ---------------------------------------------------------------------------
# STFPMModel.forward
# ---------------------------------------------------------------------------
@jax.jit
def stfpm_forward(packed_params, images):
    """Mirrors STFPMModel.forward: returns (teacher_features, student_features)."""
    b, c_in, h, w = images.shape
    assert h % 8 == 0 and w % 8 == 0 and len(packed_params) == 3

    x = jnp.transpose(images, (0, 2, 3, 1))               # NCHW -> NHWC, once
    xp = jnp.pad(x, ((0, 0), (1, 1), (0, 0), (0, 0)))     # H zero-pad only
    xp = xp.reshape(b, h + 2, w * c_in)                    # lane axis = W*Cin

    (w1, b1), (w2, b2), (w3, b3) = packed_params
    h_outs = (h // 2, h // 4, h // 8)
    w_outs = (w // 2, w // 4, w // 8)
    n_lanes = b1.shape[-1]                                 # 128: both branches

    flops = 2 * b * sum(3 * hs * wt.shape[1] * wt.shape[2]
                        for hs, (wt, _) in zip(h_outs, packed_params))
    bytes_accessed = (xp.size * xp.dtype.itemsize
                      + sum(wt.size * 2 + bt.size * 4 for wt, bt in packed_params)
                      + sum(b * hs * n_lanes * 4 for hs in h_outs))

    o1, o2, o3 = pl.pallas_call(
        _stfpm_kernel,
        out_shape=tuple(jax.ShapeDtypeStruct((b, hs, n_lanes), jnp.float32)
                        for hs in h_outs),
        grid=(b,),
        in_specs=[
            pl.BlockSpec((None, h + 2, w * c_in), lambda i: (i, 0, 0)),
            pl.BlockSpec(w1.shape, lambda i: (0, 0, 0)),
            pl.BlockSpec(b1.shape, lambda i: (0, 0)),
            pl.BlockSpec(w2.shape, lambda i: (0, 0, 0)),
            pl.BlockSpec(b2.shape, lambda i: (0, 0)),
            pl.BlockSpec(w3.shape, lambda i: (0, 0, 0)),
            pl.BlockSpec(b3.shape, lambda i: (0, 0)),
        ],
        out_specs=tuple(pl.BlockSpec((None, hs, n_lanes), lambda i: (i, 0, 0))
                        for hs in h_outs),
        scratch_shapes=[
            pltpu.VMEM((h // 2 + 2, n_lanes), jnp.float32),   # stage-2 input
            pltpu.VMEM((h // 4 + 2, n_lanes), jnp.float32),   # stage-3 input
        ],
        compiler_params=pltpu.CompilerParams(dimension_semantics=("parallel",)),
        cost_estimate=pl.CostEstimate(flops=flops, transcendentals=0,
                                      bytes_accessed=bytes_accessed),
    )(xp, w1, b1, w2, b2, w3, b3)

    teacher_feats, student_feats = [], []
    for o, hs, ws, cs in zip((o1, o2, o3), h_outs, w_outs, STAGE_CHANNELS):
        n = ws * cs
        t = jnp.transpose(o[:, :, :n].reshape(b, hs, ws, cs), (0, 3, 1, 2))
        s = jnp.transpose(o[:, :, n:2 * n].reshape(b, hs, ws, cs), (0, 3, 1, 2))
        teacher_feats.append(lax.stop_gradient(t))          # teacher is frozen (no_grad)
        student_feats.append(s)
    return teacher_feats, student_feats


# ---------------------------------------------------------------------------
# Plain-JAX reference (same bf16-operand / f32-accumulate numerics) for checks.
# ---------------------------------------------------------------------------
def _ref_backbone(params, images):
    x = jnp.transpose(images, (0, 2, 3, 1))
    feats = []
    for w, b in params:
        y = lax.conv_general_dilated(
            x.astype(COMPUTE_DTYPE), w.astype(COMPUTE_DTYPE),
            window_strides=(2, 2), padding=((1, 1), (1, 1)),
            dimension_numbers=("NHWC", "HWIO", "NHWC"),
            preferred_element_type=jnp.float32)
        x = jnp.maximum(y + b.reshape(1, 1, 1, -1), 0.0)
        feats.append(jnp.transpose(x, (0, 3, 1, 2)))
    return feats


if __name__ == "__main__":
    key = jax.random.PRNGKey(0)
    k_img, k_teacher, k_student = jax.random.split(key, 3)

    # (B, C, H, W) images, PyTorch convention.
    images = jax.random.normal(k_img, (2, 3, 16, 16), jnp.float32)
    teacher_params = init_backbone_params(k_teacher)   # pretrained / frozen stand-in
    student_params = init_backbone_params(k_student)   # randomly-initialized student

    packed = pack_stfpm_params(teacher_params, student_params, images.shape[2:])
    teacher_feats, student_feats = stfpm_forward(packed, images)
    jax.block_until_ready((teacher_feats, student_feats))

    # Pyramid shapes (B, C_i, H/2^i, W/2^i)
    expected = [(2, 8, 8, 8), (2, 16, 4, 4), (2, 32, 2, 2)]
    assert [tuple(f.shape) for f in teacher_feats] == expected
    assert [tuple(f.shape) for f in student_feats] == expected

    # Correctness: all 3 stages, both branches, vs a lax.conv reference with the
    # same bf16-operand / f32-accumulation numerics.
    ref_t = _ref_backbone(teacher_params, images)
    ref_s = _ref_backbone(student_params, images)
    for got, ref in zip(teacher_feats + student_feats, ref_t + ref_s):
        err = float(jnp.max(jnp.abs(got - ref)))
        assert jnp.allclose(got, ref, atol=2e-2, rtol=2e-2), err

    print("KERNEL_OK")
</pallas_src>

<mosaic_0001>
module attributes {stable_mosaic.version = 11 : i64} {
  func.func @_stfpm_kernel(%arg0: i32, %arg1: memref<1x18x48xf32, #tpu.memory_space<vmem>>, %arg2: memref<3x48x128xbf16, #tpu.memory_space<vmem>>, %arg3: memref<1x128xf32, #tpu.memory_space<vmem>>, %arg4: memref<3x128x128xbf16, #tpu.memory_space<vmem>>, %arg5: memref<1x128xf32, #tpu.memory_space<vmem>>, %arg6: memref<3x128x128xbf16, #tpu.memory_space<vmem>>, %arg7: memref<1x128xf32, #tpu.memory_space<vmem>>, %arg8: memref<1x8x128xf32, #tpu.memory_space<vmem>>, %arg9: memref<1x4x128xf32, #tpu.memory_space<vmem>>, %arg10: memref<1x2x128xf32, #tpu.memory_space<vmem>>, %arg11: memref<10x128xf32, #tpu.memory_space<vmem>>, %arg12: memref<6x128xf32, #tpu.memory_space<vmem>>) attributes {dimension_semantics = [#tpu.dimension_semantics<parallel>], iteration_bounds = array<i64: 2>, scalar_prefetch = 0 : i64, scratch_operands = 2 : i64, tpu.core_type = #tpu.core_type<tc>, window_params = [{transform_indices = @transform_0, window_bounds = array<i64: 1, 18, 48>}, {pipeline_mode = #tpu.pipeline_mode<synchronous>, transform_indices = @transform_1, window_bounds = array<i64: 3, 48, 128>}, {pipeline_mode = #tpu.pipeline_mode<synchronous>, transform_indices = @transform_2, window_bounds = array<i64: 1, 128>}, {pipeline_mode = #tpu.pipeline_mode<synchronous>, transform_indices = @transform_3, window_bounds = array<i64: 3, 128, 128>}, {pipeline_mode = #tpu.pipeline_mode<synchronous>, transform_indices = @transform_4, window_bounds = array<i64: 1, 128>}, {pipeline_mode = #tpu.pipeline_mode<synchronous>, transform_indices = @transform_5, window_bounds = array<i64: 3, 128, 128>}, {pipeline_mode = #tpu.pipeline_mode<synchronous>, transform_indices = @transform_6, window_bounds = array<i64: 1, 128>}, {transform_indices = @transform_7, window_bounds = array<i64: 1, 8, 128>}, {transform_indices = @transform_8, window_bounds = array<i64: 1, 4, 128>}, {transform_indices = @transform_9, window_bounds = array<i64: 1, 2, 128>}]} {
    %c0 = arith.constant 0 : index
    %c0_0 = arith.constant 0 : index
    %c0_1 = arith.constant 0 : index
    %0 = tpu.strided_load %arg1[%c0, %c0_0, %c0_1] {strides = array<i32: 1, 2, 1>} : memref<1x18x48xf32, #tpu.memory_space<vmem>>, vector<1x8x48xf32>
    %1 = vector.shape_cast %0 : vector<1x8x48xf32> to vector<8x48xf32>
    %2 = arith.truncf %1 : vector<8x48xf32> to vector<8x48xbf16>
    %c0_2 = arith.constant 0 : index
    %c1 = arith.constant 1 : index
    %c0_3 = arith.constant 0 : index
    %3 = tpu.strided_load %arg1[%c0_2, %c1, %c0_3] {strides = array<i32: 1, 2, 1>} : memref<1x18x48xf32, #tpu.memory_space<vmem>>, vector<1x8x48xf32>
    %4 = vector.shape_cast %3 : vector<1x8x48xf32> to vector<8x48xf32>
    %5 = arith.truncf %4 : vector<8x48xf32> to vector<8x48xbf16>
    %c0_4 = arith.constant 0 : index
    %c2 = arith.constant 2 : index
    %c0_5 = arith.constant 0 : index
    %6 = tpu.strided_load %arg1[%c0_4, %c2, %c0_5] {strides = array<i32: 1, 2, 1>} : memref<1x18x48xf32, #tpu.memory_space<vmem>>, vector<1x8x48xf32>
    %7 = vector.shape_cast %6 : vector<1x8x48xf32> to vector<8x48xf32>
    %8 = arith.truncf %7 : vector<8x48xf32> to vector<8x48xbf16>
    %c0_6 = arith.constant 0 : index
    %c0_7 = arith.constant 0 : index
    %c0_8 = arith.constant 0 : index
    %9 = vector.load %arg2[%c0_6, %c0_7, %c0_8] : memref<3x48x128xbf16, #tpu.memory_space<vmem>>, vector<1x48x128xbf16>
    %10 = vector.shape_cast %9 : vector<1x48x128xbf16> to vector<48x128xbf16>
    %cst = arith.constant dense<0.000000e+00> : vector<8x128xf32>
    %11 = tpu.matmul %2, %10, %cst {dimension_numbers = #tpu.dot_dimension_numbers<[1], [0], [0], [1], [0, 0, 1, 1], [], []>} : vector<8x48xbf16>, vector<48x128xbf16>, vector<8x128xf32> -> vector<8x128xf32>
    %c1_9 = arith.constant 1 : index
    %c0_10 = arith.constant 0 : index
    %c0_11 = arith.constant 0 : index
    %12 = vector.load %arg2[%c1_9, %c0_10, %c0_11] : memref<3x48x128xbf16, #tpu.memory_space<vmem>>, vector<1x48x128xbf16>
    %13 = vector.shape_cast %12 : vector<1x48x128xbf16> to vector<48x128xbf16>
    %cst_12 = arith.constant dense<0.000000e+00> : vector<8x128xf32>
    %14 = tpu.matmul %5, %13, %cst_12 {dimension_numbers = #tpu.dot_dimension_numbers<[1], [0], [0], [1], [0, 0, 1, 1], [], []>} : vector<8x48xbf16>, vector<48x128xbf16>, vector<8x128xf32> -> vector<8x128xf32>
    %15 = arith.addf %11, %14 : vector<8x128xf32>
    %c2_13 = arith.constant 2 : index
    %c0_14 = arith.constant 0 : index
    %c0_15 = arith.constant 0 : index
    %16 = vector.load %arg2[%c2_13, %c0_14, %c0_15] : memref<3x48x128xbf16, #tpu.memory_space<vmem>>, vector<1x48x128xbf16>
    %17 = vector.shape_cast %16 : vector<1x48x128xbf16> to vector<48x128xbf16>
    %cst_16 = arith.constant dense<0.000000e+00> : vector<8x128xf32>
    %18 = tpu.matmul %8, %17, %cst_16 {dimension_numbers = #tpu.dot_dimension_numbers<[1], [0], [0], [1], [0, 0, 1, 1], [], []>} : vector<8x48xbf16>, vector<48x128xbf16>, vector<8x128xf32> -> vector<8x128xf32>
    %19 = arith.addf %15, %18 : vector<8x128xf32>
    %c0_17 = arith.constant 0 : index
    %c0_18 = arith.constant 0 : index
    %20 = vector.load %arg3[%c0_17, %c0_18] : memref<1x128xf32, #tpu.memory_space<vmem>>, vector<1x128xf32>
    %21 = vector.broadcast %20 : vector<1x128xf32> to vector<8x128xf32>
    %22 = arith.addf %19, %21 : vector<8x128xf32>
    %cst_19 = arith.constant 0.000000e+00 : f32
    %23 = vector.broadcast %cst_19 : f32 to vector<8x128xf32>
    %24 = arith.maximumf %22, %23 : vector<8x128xf32>
    %c0_20 = arith.constant 0 : index
    %c0_21 = arith.constant 0 : index
    %c0_22 = arith.constant 0 : index
    %25 = vector.load %arg8[%c0_20, %c0_21, %c0_22] : memref<1x8x128xf32, #tpu.memory_space<vmem>>, vector<1x8x128xf32>
    %26 = vector.shape_cast %25 : vector<1x8x128xf32> to vector<8x128xf32>
    %27 = vector.shape_cast %24 : vector<8x128xf32> to vector<1x8x128xf32>
    tpu.vector_store %arg8[%c0_20, %c0_21, %c0_22], %27 {strides = array<i32>} : memref<1x8x128xf32, #tpu.memory_space<vmem>>, vector<1x8x128xf32>,
    %cst_23 = arith.constant 0.000000e+00 : f32
    %28 = vector.broadcast %cst_23 : f32 to vector<1x128xf32>
    %c0_24 = arith.constant 0 : index
    %c0_25 = arith.constant 0 : index
    %29 = vector.load %arg11[%c0_24, %c0_25] : memref<10x128xf32, #tpu.memory_space<vmem>>, vector<1x128xf32>
    tpu.vector_store %arg11[%c0_24, %c0_25], %28 {strides = array<i32>} : memref<10x128xf32, #tpu.memory_space<vmem>>, vector<1x128xf32>,
    %c1_26 = arith.constant 1 : index
    %c0_27 = arith.constant 0 : index
    %30 = vector.load %arg11[%c1_26, %c0_27] : memref<10x128xf32, #tpu.memory_space<vmem>>, vector<8x128xf32>
    tpu.vector_store %arg11[%c1_26, %c0_27], %24 {strides = array<i32>} : memref<10x128xf32, #tpu.memory_space<vmem>>, vector<8x128xf32>,
    %c0_28 = arith.constant 0 : index
    %c0_29 = arith.constant 0 : index
    %31 = tpu.strided_load %arg11[%c0_28, %c0_29] {strides = array<i32: 2, 1>} : memref<10x128xf32, #tpu.memory_space<vmem>>, vector<4x128xf32>
    %32 = arith.truncf %31 : vector<4x128xf32> to vector<4x128xbf16>
    %c1_30 = arith.constant 1 : index
    %c0_31 = arith.constant 0 : index
    %33 = tpu.strided_load %arg11[%c1_30, %c0_31] {strides = array<i32: 2, 1>} : memref<10x128xf32, #tpu.memory_space<vmem>>, vector<4x128xf32>
    %34 = arith.truncf %33 : vector<4x128xf32> to vector<4x128xbf16>
    %c2_32 = arith.constant 2 : index
    %c0_33 = arith.constant 0 : index
    %35 = tpu.strided_load %arg11[%c2_32, %c0_33] {strides = array<i32: 2, 1>} : memref<10x128xf32, #tpu.memory_space<vmem>>, vector<4x128xf32>
    %36 = arith.truncf %35 : vector<4x128xf32> to vector<4x128xbf16>
    %c0_34 = arith.constant 0 : index
    %c0_35 = arith.constant 0 : index
    %c0_36 = arith.constant 0 : index
    %37 = vector.load %arg4[%c0_34, %c0_35, %c0_36] : memref<3x128x128xbf16, #tpu.memory_space<vmem>>, vector<1x128x128xbf16>
    %38 = vector.shape_cast %37 : vector<1x128x128xbf16> to vector<128x128xbf16>
    %cst_37 = arith.constant dense<0.000000e+00> : vector<4x128xf32>
    %39 = tpu.matmul %32, %38, %cst_37 {dimension_numbers = #tpu.dot_dimension_numbers<[1], [0], [0], [1], [0, 0, 1, 1], [], []>} : vector<4x128xbf16>, vector<128x128xbf16>, vector<4x128xf32> -> vector<4x128xf32>
    %c1_38 = arith.constant 1 : index
    %c0_39 = arith.constant 0 : index
    %c0_40 = arith.constant 0 : index
    %40 = vector.load %arg4[%c1_38, %c0_39, %c0_40] : memref<3x128x128xbf16, #tpu.memory_space<vmem>>, vector<1x128x128xbf16>
    %41 = vector.shape_cast %40 : vector<1x128x128xbf16> to vector<128x128xbf16>
    %cst_41 = arith.constant dense<0.000000e+00> : vector<4x128xf32>
    %42 = tpu.matmul %34, %41, %cst_41 {dimension_numbers = #tpu.dot_dimension_numbers<[1], [0], [0], [1], [0, 0, 1, 1], [], []>} : vector<4x128xbf16>, vector<128x128xbf16>, vector<4x128xf32> -> vector<4x128xf32>
    %43 = arith.addf %39, %42 : vector<4x128xf32>
    %c2_42 = arith.constant 2 : index
    %c0_43 = arith.constant 0 : index
    %c0_44 = arith.constant 0 : index
    %44 = vector.load %arg4[%c2_42, %c0_43, %c0_44] : memref<3x128x128xbf16, #tpu.memory_space<vmem>>, vector<1x128x128xbf16>
    %45 = vector.shape_cast %44 : vector<1x128x128xbf16> to vector<128x128xbf16>
    %cst_45 = arith.constant dense<0.000000e+00> : vector<4x128xf32>
    %46 = tpu.matmul %36, %45, %cst_45 {dimension_numbers = #tpu.dot_dimension_numbers<[1], [0], [0], [1], [0, 0, 1, 1], [], []>} : vector<4x128xbf16>, vector<128x128xbf16>, vector<4x128xf32> -> vector<4x128xf32>
    %47 = arith.addf %43, %46 : vector<4x128xf32>
    %c0_46 = arith.constant 0 : index
    %c0_47 = arith.constant 0 : index
    %48 = vector.load %arg5[%c0_46, %c0_47] : memref<1x128xf32, #tpu.memory_space<vmem>>, vector<1x128xf32>
    %49 = vector.broadcast %48 : vector<1x128xf32> to vector<4x128xf32>
    %50 = arith.addf %47, %49 : vector<4x128xf32>
    %cst_48 = arith.constant 0.000000e+00 : f32
    %51 = vector.broadcast %cst_48 : f32 to vector<4x128xf32>
    %52 = arith.maximumf %50, %51 : vector<4x128xf32>
    %c0_49 = arith.constant 0 : index
    %c0_50 = arith.constant 0 : index
    %c0_51 = arith.constant 0 : index
    %53 = vector.load %arg9[%c0_49, %c0_50, %c0_51] : memref<1x4x128xf32, #tpu.memory_space<vmem>>, vector<1x4x128xf32>
    %54 = vector.shape_cast %53 : vector<1x4x128xf32> to vector<4x128xf32>
    %55 = vector.shape_cast %52 : vector<4x128xf32> to vector<1x4x128xf32>
    tpu.vector_store %arg9[%c0_49, %c0_50, %c0_51], %55 {strides = array<i32>} : memref<1x4x128xf32, #tpu.memory_space<vmem>>, vector<1x4x128xf32>,
    %cst_52 = arith.constant 0.000000e+00 : f32
    %56 = vector.broadcast %cst_52 : f32 to vector<1x128xf32>
    %c0_53 = arith.constant 0 : index
    %c0_54 = arith.constant 0 : index
    %57 = vector.load %arg12[%c0_53, %c0_54] : memref<6x128xf32, #tpu.memory_space<vmem>>, vector<1x128xf32>
    tpu.vector_store %arg12[%c0_53, %c0_54], %56 {strides = array<i32>} : memref<6x128xf32, #tpu.memory_space<vmem>>, vector<1x128xf32>,
    %c1_55 = arith.constant 1 : index
    %c0_56 = arith.constant 0 : index
    %58 = vector.load %arg12[%c1_55, %c0_56] : memref<6x128xf32, #tpu.memory_space<vmem>>, vector<4x128xf32>
    tpu.vector_store %arg12[%c1_55, %c0_56], %52 {strides = array<i32>} : memref<6x128xf32, #tpu.memory_space<vmem>>, vector<4x128xf32>,
    %c0_57 = arith.constant 0 : index
    %c0_58 = arith.constant 0 : index
    %59 = tpu.strided_load %arg12[%c0_57, %c0_58] {strides = array<i32: 2, 1>} : memref<6x128xf32, #tpu.memory_space<vmem>>, vector<2x128xf32>
    %60 = arith.truncf %59 : vector<2x128xf32> to vector<2x128xbf16>
    %c1_59 = arith.constant 1 : index
    %c0_60 = arith.constant 0 : index
    %61 = tpu.strided_load %arg12[%c1_59, %c0_60] {strides = array<i32: 2, 1>} : memref<6x128xf32, #tpu.memory_space<vmem>>, vector<2x128xf32>
    %62 = arith.truncf %61 : vector<2x128xf32> to vector<2x128xbf16>
    %c2_61 = arith.constant 2 : index
    %c0_62 = arith.constant 0 : index
    %63 = tpu.strided_load %arg12[%c2_61, %c0_62] {strides = array<i32: 2, 1>} : memref<6x128xf32, #tpu.memory_space<vmem>>, vector<2x128xf32>
    %64 = arith.truncf %63 : vector<2x128xf32> to vector<2x128xbf16>
    %c0_63 = arith.constant 0 : index
    %c0_64 = arith.constant 0 : index
    %c0_65 = arith.constant 0 : index
    %65 = vector.load %arg6[%c0_63, %c0_64, %c0_65] : memref<3x128x128xbf16, #tpu.memory_space<vmem>>, vector<1x128x128xbf16>
    %66 = vector.shape_cast %65 : vector<1x128x128xbf16> to vector<128x128xbf16>
    %cst_66 = arith.constant dense<0.000000e+00> : vector<2x128xf32>
    %67 = tpu.matmul %60, %66, %cst_66 {dimension_numbers = #tpu.dot_dimension_numbers<[1], [0], [0], [1], [0, 0, 1, 1], [], []>} : vector<2x128xbf16>, vector<128x128xbf16>, vector<2x128xf32> -> vector<2x128xf32>
    %c1_67 = arith.constant 1 : index
    %c0_68 = arith.constant 0 : index
    %c0_69 = arith.constant 0 : index
    %68 = vector.load %arg6[%c1_67, %c0_68, %c0_69] : memref<3x128x128xbf16, #tpu.memory_space<vmem>>, vector<1x128x128xbf16>
    %69 = vector.shape_cast %68 : vector<1x128x128xbf16> to vector<128x128xbf16>
    %cst_70 = arith.constant dense<0.000000e+00> : vector<2x128xf32>
    %70 = tpu.matmul %62, %69, %cst_70 {dimension_numbers = #tpu.dot_dimension_numbers<[1], [0], [0], [1], [0, 0, 1, 1], [], []>} : vector<2x128xbf16>, vector<128x128xbf16>, vector<2x128xf32> -> vector<2x128xf32>
    %71 = arith.addf %67, %70 : vector<2x128xf32>
    %c2_71 = arith.constant 2 : index
    %c0_72 = arith.constant 0 : index
    %c0_73 = arith.constant 0 : index
    %72 = vector.load %arg6[%c2_71, %c0_72, %c0_73] : memref<3x128x128xbf16, #tpu.memory_space<vmem>>, vector<1x128x128xbf16>
    %73 = vector.shape_cast %72 : vector<1x128x128xbf16> to vector<128x128xbf16>
    %cst_74 = arith.constant dense<0.000000e+00> : vector<2x128xf32>
    %74 = tpu.matmul %64, %73, %cst_74 {dimension_numbers = #tpu.dot_dimension_numbers<[1], [0], [0], [1], [0, 0, 1, 1], [], []>} : vector<2x128xbf16>, vector<128x128xbf16>, vector<2x128xf32> -> vector<2x128xf32>
    %75 = arith.addf %71, %74 : vector<2x128xf32>
    %c0_75 = arith.constant 0 : index
    %c0_76 = arith.constant 0 : index
    %76 = vector.load %arg7[%c0_75, %c0_76] : memref<1x128xf32, #tpu.memory_space<vmem>>, vector<1x128xf32>
    %77 = vector.broadcast %76 : vector<1x128xf32> to vector<2x128xf32>
    %78 = arith.addf %75, %77 : vector<2x128xf32>
    %cst_77 = arith.constant 0.000000e+00 : f32
    %79 = vector.broadcast %cst_77 : f32 to vector<2x128xf32>
    %80 = arith.maximumf %78, %79 : vector<2x128xf32>
    %c0_78 = arith.constant 0 : index
    %c0_79 = arith.constant 0 : index
    %c0_80 = arith.constant 0 : index
    %81 = vector.load %arg10[%c0_78, %c0_79, %c0_80] : memref<1x2x128xf32, #tpu.memory_space<vmem>>, vector<1x2x128xf32>
    %82 = vector.shape_cast %81 : vector<1x2x128xf32> to vector<2x128xf32>
    %83 = vector.shape_cast %80 : vector<2x128xf32> to vector<1x2x128xf32>
    tpu.vector_store %arg10[%c0_78, %c0_79, %c0_80], %83 {strides = array<i32>} : memref<1x2x128xf32, #tpu.memory_space<vmem>>, vector<1x2x128xf32>,
    return
  }
  func.func @transform_0(%arg0: i32) -> (i32, i32, i32) {
    %c0_i32 = arith.constant 0 : i32
    %c0_i32_0 = arith.constant 0 : i32
    %c0_i32_1 = arith.constant 0 : i32
    return %arg0, %c0_i32, %c0_i32_0 : i32, i32, i32
  }
  func.func @transform_1(%arg0: i32) -> (i32, i32, i32) {
    %c0_i32 = arith.constant 0 : i32
    %c0_i32_0 = arith.constant 0 : i32
    %c0_i32_1 = arith.constant 0 : i32
    %c0_i32_2 = arith.constant 0 : i32
    return %c0_i32, %c0_i32_0, %c0_i32_1 : i32, i32, i32
  }
  func.func @transform_2(%arg0: i32) -> (i32, i32) {
    %c0_i32 = arith.constant 0 : i32
    %c0_i32_0 = arith.constant 0 : i32
    %c0_i32_1 = arith.constant 0 : i32
    return %c0_i32, %c0_i32_0 : i32, i32
  }
  func.func @transform_3(%arg0: i32) -> (i32, i32, i32) {
    %c0_i32 = arith.constant 0 : i32
    %c0_i32_0 = arith.constant 0 : i32
    %c0_i32_1 = arith.constant 0 : i32
    %c0_i32_2 = arith.constant 0 : i32
    return %c0_i32, %c0_i32_0, %c0_i32_1 : i32, i32, i32
  }
  func.func @transform_4(%arg0: i32) -> (i32, i32) {
    %c0_i32 = arith.constant 0 : i32
    %c0_i32_0 = arith.constant 0 : i32
    %c0_i32_1 = arith.constant 0 : i32
    return %c0_i32, %c0_i32_0 : i32, i32
  }
  func.func @transform_5(%arg0: i32) -> (i32, i32, i32) {
    %c0_i32 = arith.constant 0 : i32
    %c0_i32_0 = arith.constant 0 : i32
    %c0_i32_1 = arith.constant 0 : i32
    %c0_i32_2 = arith.constant 0 : i32
    return %c0_i32, %c0_i32_0, %c0_i32_1 : i32, i32, i32
  }
  func.func @transform_6(%arg0: i32) -> (i32, i32) {
    %c0_i32 = arith.constant 0 : i32
    %c0_i32_0 = arith.constant 0 : i32
    %c0_i32_1 = arith.constant 0 : i32
    return %c0_i32, %c0_i32_0 : i32, i32
  }
  func.func @transform_7(%arg0: i32) -> (i32, i32, i32) {
    %c0_i32 = arith.constant 0 : i32
    %c0_i32_0 = arith.constant 0 : i32
    %c0_i32_1 = arith.constant 0 : i32
    return %arg0, %c0_i32, %c0_i32_0 : i32, i32, i32
  }
  func.func @transform_8(%arg0: i32) -> (i32, i32, i32) {
    %c0_i32 = arith.constant 0 : i32
    %c0_i32_0 = arith.constant 0 : i32
    %c0_i32_1 = arith.constant 0 : i32
    return %arg0, %c0_i32, %c0_i32_0 : i32, i32, i32
  }
  func.func @transform_9(%arg0: i32) -> (i32, i32, i32) {
    %c0_i32 = arith.constant 0 : i32
    %c0_i32_0 = arith.constant 0 : i32
    %c0_i32_1 = arith.constant 0 : i32
    return %arg0, %c0_i32, %c0_i32_0 : i32, i32, i32
  }
}

</mosaic_0001>

<bundles_post_ra>
// kernel: stfpm_forward.1
= control target key start
LH: loop header
LB: loop body
LE: loop exit
PB: predicated region body
PF: predicated region fallthrough
CT: control target
= control target key end

     0   :  { %s1857_s30 = smov 0   ;;  %s2146_s0 = inlined_call_operand.vmem [shape: f32[2,18,48], index: 0, kind: input, shape index: {}]   ;;  %s2147_s1 = inlined_call_operand.vmem [shape: bf16[3,48,128], index: 1, kind: input, shape index: {}]   ;;  %s2148_s2 = inlined_call_operand.vmem [shape: f32[1,128], index: 2, kind: input, shape index: {}]   ;;  %s2149_s3 = inlined_call_operand.vmem [shape: bf16[3,128,128], index: 3, kind: input, shape index: {}]   ;;  %s2150_s4 = inlined_call_operand.vmem [shape: f32[1,128], index: 4, kind: input, shape index: {}]   ;;  %s2151_s5 = inlined_call_operand.vmem [shape: bf16[3,128,128], index: 5, kind: input, shape index: {}]   ;;  %s2152_s6 = inlined_call_operand.vmem [shape: f32[1,128], index: 6, kind: input, shape index: {}]   ;;  %s2153_s7 = inlined_call_operand.vmem [shape: f32[2,8,128], index: 7, kind: output, shape index: {0}]   ;;  %s2154_s8 = inlined_call_operand.vmem [shape: f32[2,4,128], index: 8, kind: output, shape index: {1}]   ;;  %s2155_s9 = inlined_call_operand.vmem [shape: f32[2,2,128], index: 9, kind: output, shape index: {2}]  }
   0x1 LB: > { %s1361_s10 = sadd.s32 4294967295, %s1803_s30   ;;  %p1365_p0 = scmp.ge.s32.totalorder %s1803_s30, 1  ;;  %s1803_s30 = sphi %s1857_s30, %s20_s30  }
   0x2   : > { %p292_p1 = scmp.lt.s32.totalorder %s1803_s30, 3 }
   0x4   : > { %p293_p2 = pnand %p1365_p0, %p292_p1 }
   0x5   : > { %v1740_v0 = vld [vmem:[%s2147_s1 + $0x18] sm:$0xff] (!%p293_p2)   ;;  %v1805_v1 = vmov (!%p293_p2), 0.0   ;;  %v1741_v2 = vld [vmem:[%s2147_s1] sm:$0xff] (!%p293_p2)   ;;  %vm1806_vm0 = vmmov (!%p293_p2), 0   ;;  %p335_p3 = scmp.lt.s32.totalorder (!%p293_p2), %s1361_s10, 1  ;;  %v1743_v4 = vld [vmem:[%s2147_s1 + $0x8] sm:$0xff] (!%p293_p2)  }
   0x6   : > { %296 = sbr.rel (%p293_p2) target bundleno = 771 (0x303), region = 48  ;;  %1579 = vmatprep.subr.bf16.mxu0 (!%p293_p2), %v1805_v1  ;;  %576 = vst [vmem:[#allocation2] sm:$0x1] (!%p293_p2), %v1805_v1  ;;  %911 = vst [vmem:[#allocation3] sm:$0x1] (!%p293_p2), %v1805_v1  ;;  %1589 = vmatprep.subr.bf16.mxu1 (!%p293_p2), %v1805_v1  ;;  %v1742_v3 = vld [vmem:[%s2147_s1 + $0x20] sm:$0xff] (!%p293_p2)  }
   0x7   : > { %1580 = vmatpush3.bf16.msra.mxu0 (!%p293_p2), %v1740_v0  ;;  %1585 = vmatprep.mubr.msk.bf16.mxu0 (!%p293_p2), %vm1806_vm0, %v1805_v1  ;;  %v1744_v5 = vld [vmem:[%s2147_s1 + $0x28] sm:$0xff] (!%p293_p2)   ;;  %v1745_v6 = vld [vmem:[%s2147_s1 + $0x10] sm:$0xff] (!%p293_p2)   ;;  %vm392_vm1 = vcmask (!%p293_p2), 392192   ;;  %v1749_v12 = vld [vmem:[%s2149_s3 + $0x40] sm:$0xff] (!%p293_p2)  }
   0x8   : > { %1590 = vmatpush3.bf16.msra.mxu1 (!%p293_p2), %v1741_v2  ;;  %1581 = vmatprep.subr.bf16.mxu0 (!%p293_p2), %v1805_v1  ;;  %v1746_v11 = vld [vmem:[%s2147_s1 + $0x30] sm:$0xff] (!%p293_p2)   ;;  %v1747_v13 = vld [vmem:[%s2147_s1 + $0x38] sm:$0xff] (!%p293_p2)   ;;  %v1748_v14 = vld [vmem:[%s2147_s1 + $0x40] sm:$0xff] (!%p293_p2)  }
   0x9   : > { %1591 = vmatprep.subr.bf16.mxu1 (!%p293_p2), %v1805_v1  ;;  %1595 = vmatprep.mubr.msk.bf16.mxu1 (!%p293_p2), %vm1806_vm0, %v1805_v1  ;;  %v1750_v16 = vld [vmem:[%s2149_s3] sm:$0xff] (!%p293_p2)   ;;  %v1751_v18 = vld [vmem:[%s2149_s3 + $0x48] sm:$0xff] (!%p293_p2)   ;;  %v1753_v20 = vld [vmem:[%s2149_s3 + $0x50] sm:$0xff] (!%p293_p2)  }
   0xa   : > { %v1752_v19 = vld [vmem:[%s2149_s3 + $0x8] sm:$0xff] (!%p293_p2)   ;;  %v1754_v21 = vld [vmem:[%s2149_s3 + $0x10] sm:$0xff] (!%p293_p2)   ;;  %v1755_v22 = vld [vmem:[%s2149_s3 + $0x58] sm:$0xff] (!%p293_p2)  }
   0xb   : > { %1582 = vmatpush3.bf16.msra.mxu0 (!%p293_p2), %v1742_v3  ;;  %v1756_v23 = vld [vmem:[%s2149_s3 + $0x18] sm:$0xff] (!%p293_p2)   ;;  %v1757_v24 = vld [vmem:[%s2149_s3 + $0x60] sm:$0xff] (!%p293_p2)   ;;  %v1759_v26 = vld [vmem:[%s2149_s3 + $0x68] sm:$0xff] (!%p293_p2)  }
   0xc   : > { %1592 = vmatpush3.bf16.msra.mxu1 (!%p293_p2), %v1743_v4  ;;  %1583 = vmatprep.subr.bf16.mxu0 (!%p293_p2), %v1805_v1  ;;  %v1758_v25 = vld [vmem:[%s2149_s3 + $0x20] sm:$0xff] (!%p293_p2)   ;;  %v1760_v27 = vld [vmem:[%s2149_s3 + $0x28] sm:$0xff] (!%p293_p2)   ;;  %v1761_v28 = vld [vmem:[%s2149_s3 + $0x70] sm:$0xff] (!%p293_p2)  }
   0xd   : > { %s2157_s10 = smov (!%p335_p3, %s1361_s10), 1  ;;  %1593 = vmatprep.subr.bf16.mxu1 %v1805_v1  ;;  %v1762_v29 = vld [vmem:[%s2149_s3 + $0x30] sm:$0xff]   ;;  %v1763_v30 = vld [vmem:[%s2149_s3 + $0x78] sm:$0xff]   ;;  %v1396_v42 = vld [vmem:[%s2148_s2] ss:$0 sm:$0xff] }
   0xe   : > { %s1729_s21 = smul.u32 24, %s2157_s10  ;;  %v1764_v31 = vld [vmem:[%s2149_s3 + $0x38] sm:$0xff]   ;;  %s1367_s29 = sshll.u32 %s2157_s10, 3  ;;  %v1765_v49 = vld [vmem:[%s2149_s3 + $0x80] sm:$0xff]   ;;  %v1766_v54 = vld [vmem:[%s2149_s3 + $0x88] sm:$0xff]  }
   0xf   : > { %1584 = vmatpush3.bf16.msra.mxu0 %v1744_v5  ;;  %s343_s13 = scalar_lea.vmem %s2153_s7, %s1367_s29  ;;  %v1767_v55 = vld [vmem:[%s2149_s3 + $0x90] sm:$0xff]   ;;  %v1768_v56 = vld [vmem:[%s2149_s3 + $0x98] sm:$0xff]   ;;  %v1769_v57 = vld [vmem:[%s2149_s3 + $0xa0] sm:$0xff]  }
  0x10   : > { %s339_s26 = scalar_lea.vmem %s2146_s0, %s1729_s21  ;;  %1594 = vmatpush3.bf16.msra.mxu1 %v1745_v6  ;;  %1599 = vmatprep.subr.bf16.mxu0 %v1805_v1  ;;  %v1770_v58 = vld [vmem:[%s2149_s3 + $0xa8] sm:$0xff]   ;;  %v1771_v59 = vld [vmem:[%s2149_s3 + $0xb0] sm:$0xff]   ;;  %v1772_v60 = vld [vmem:[%s2149_s3 + $0xb8] sm:$0xff]  }
  0x11   : > { %v1370_v7 = vld [vmem:[%s339_s26 + $0x1] ss:$2 sm:$0xff]  ;;  %v353_v8 = vld [vmem:[%s339_s26] ss:$2 sm:$0xff]  ;;  %1609 = vmatprep.subr.bf16.mxu1 %v1805_v1  ;;  %v1777_v4 = vld [vmem:[%s2151_s5 + $0x50] sm:$0xff]  }
  0x12   : > { %v357_v9 = vpack.c.bf16 %v1370_v7, %v1370_v7  ;;  %v354_v10 = vpack.c.bf16 %v353_v8, %v353_v8  ;;  %v1371_v15 = vld [vmem:[%s339_s26 + $0x2] ss:$2 sm:$0xff]  ;;  %v1779_v6 = vld [vmem:[%s2151_s5 + $0x58] sm:$0xff]   ;;  %s1368_s26 = sshll.u32 %s2157_s10, 2 }
  0x13   : > { %v360_v17 = vpack.c.bf16 %v1371_v15, %v1371_v15  ;;  %v1773_v63 = vld [vmem:[%s2151_s5 + $0x40] sm:$0xff]   ;;  %v1775_v2 = vld [vmem:[%s2151_s5 + $0x48] sm:$0xff]   ;;  %v1778_v5 = vld [vmem:[%s2151_s5 + $0x10] sm:$0xff]   ;;  %s347_s29 = scalar_lea.vmem %s2154_s8, %s1368_s26 }
  0x14   : > { %1586 = vmatmul.mubr.msk.bf16.vlgmr.msra.gmra.mrb[0].mxu0 %vm392_vm1, %v357_v9  ;;  %1596 = vmatmul.mubr.msk.bf16.vlgmr.msra.gmra.mrb[0].mxu1 %vm392_vm1, %v354_v10  ;;  %v1774_v0 = vld [vmem:[%s2151_s5] sm:$0xff]   ;;  %v1776_v3 = vld [vmem:[%s2151_s5 + $0x8] sm:$0xff]   ;;  %v1780_v7 = vld [vmem:[%s2151_s5 + $0x18] sm:$0xff]  }
  0x15   : > { %1600 = vmatpush3.bf16.msra.mxu0 %v1746_v11  ;;  %1605 = vmatprep.mubr.msk.bf16.mxu0 %vm1806_vm0, %v1805_v1  ;;  %v1781_v8 = vld [vmem:[%s2151_s5 + $0x60] sm:$0xff]   ;;  %v1783_v10 = vld [vmem:[%s2151_s5 + $0x68] sm:$0xff]   ;;  %v1788_v15 = vld [vmem:[%s2151_s5 + $0x38] sm:$0xff]  }
  0x16   : > { %1601 = vmatprep.subr.bf16.mxu0 %v1805_v1  ;;  %1610 = vmatpush3.bf16.msra.mxu1 %v1749_v12  ;;  %v1782_v9 = vld [vmem:[%s2151_s5 + $0x20] sm:$0xff]   ;;  %v1784_v11 = vld [vmem:[%s2151_s5 + $0x28] sm:$0xff]   ;;  %v1785_v12 = vld [vmem:[%s2151_s5 + $0x70] sm:$0xff]  }
  0x17   : > { %1625 = vmatprep.mubr.msk.bf16.mxu1 %vm1806_vm0, %v1805_v1  ;;  %1611 = vmatprep.subr.bf16.mxu1 %v1805_v1 }
  0x19   : > { %1602 = vmatpush3.bf16.msra.mxu0 %v1747_v13  ;;  %v1786_v13 = vld [vmem:[%s2151_s5 + $0x30] sm:$0xff]  }
  0x1a   : > { %1603 = vmatprep.subr.bf16.mxu0 %v1805_v1  ;;  %1612 = vmatpush3.bf16.msra.mxu1 %v1751_v18 }
  0x1b   : > { %1613 = vmatprep.subr.bf16.mxu1 %v1805_v1 }
  0x1d   : > { %1604 = vmatpush3.bf16.msra.mxu0 %v1748_v14  ;;  %v1787_v14 = vld [vmem:[%s2151_s5 + $0x78] sm:$0xff]  }
  0x1e   : > { %1629 = vmatprep.subr.bf16.mxu0 %v1805_v1  ;;  %1614 = vmatpush3.bf16.msra.mxu1 %v1753_v20 }
  0x1f   : > { %1615 = vmatprep.subr.bf16.mxu1 %v1805_v1 }
  0x20   : > { %1606 = vmatmul.mubr.msk.bf16.vlgmr.msra.gmra.mrb[4].mxu0 %vm392_vm1, %v360_v17 }
  0x21   : > { %1630 = vmatpush3.bf16.msra.mxu0 %v1750_v16  ;;  %1645 = vmatprep.mubr.msk.bf16.mxu0 %vm1806_vm0, %v1805_v1 }
  0x22   : > { %1631 = vmatprep.subr.bf16.mxu0 %v1805_v1  ;;  %1616 = vmatpush3.bf16.msra.mxu1 %v1755_v22 }
  0x23   : > { %1617 = vmatprep.subr.bf16.mxu1 %v1805_v1 }
  0x25   : > { %1632 = vmatpush3.bf16.msra.mxu0 %v1752_v19 }
  0x26   : > { %1633 = vmatprep.subr.bf16.mxu0 %v1805_v1  ;;  %1618 = vmatpush3.bf16.msra.mxu1 %v1757_v24 }
  0x27   : > { %1619 = vmatprep.subr.bf16.mxu1 %v1805_v1 }
  0x29   : > { %1634 = vmatpush3.bf16.msra.mxu0 %v1754_v21 }
  0x2a   : > { %1635 = vmatprep.subr.bf16.mxu0 %v1805_v1  ;;  %1620 = vmatpush3.bf16.msra.mxu1 %v1759_v26  ;;  %v1453_v26 = vld [vmem:[%s2150_s4] ss:$0 sm:$0xff] }
  0x2b   : > { %1621 = vmatprep.subr.bf16.mxu1 %v1805_v1 }
  0x2d   : > { %1636 = vmatpush3.bf16.msra.mxu0 %v1756_v23 }
  0x2e   : > { %1637 = vmatprep.subr.bf16.mxu0 %v1805_v1  ;;  %1622 = vmatpush3.bf16.msra.mxu1 %v1761_v28 }
  0x2f   : > { %1623 = vmatprep.subr.bf16.mxu1 %v1805_v1 }
  0x31   : > { %1638 = vmatpush3.bf16.msra.mxu0 %v1758_v25 }
  0x32   : > { %1639 = vmatprep.subr.bf16.mxu0 %v1805_v1  ;;  %1624 = vmatpush3.bf16.msra.mxu1 %v1763_v30 }
  0x33   : > { %1649 = vmatprep.subr.bf16.mxu1 %v1805_v1 }
  0x35   : > { %1640 = vmatpush3.bf16.msra.mxu0 %v1760_v27 }
  0x36   : > { %1641 = vmatprep.subr.bf16.mxu0 %v1805_v1 }
  0x39   : > { %1642 = vmatpush3.bf16.msra.mxu0 %v1762_v29 }
  0x3a   : > { %1643 = vmatprep.subr.bf16.mxu0 %v1805_v1 }
  0x3d   : > { %1644 = vmatpush3.bf16.msra.mxu0 %v1764_v31 }
  0x3e   : > { %1669 = vmatprep.subr.bf16.mxu0 %v1805_v1 }
  0xe7   : > { %v430_v32 = vpop.f32.mrb[0].mxu0  ;;  %v491_v34 = vpop.f32.mrb[0].mxu1 }
  0xe8   : > { %v1587_v33 = vpop.f32.mrb[1].mxu0  ;;  %v492_v35 = vadd.f32 %v491_v34, %v430_v32  ;;  %v1597_v37 = vpop.f32.mrb[1].mxu1 }
  0xe9   : > { %v433_v36 = vpop.f32.mrb[2].mxu0  ;;  %v494_v39 = vpop.f32.mrb[2].mxu1  ;;  %v1789_v33 = vld [vmem:[%s2151_s5 + $0x80] sm:$0xff]  }
  0xea   : > { %v1588_v38 = vpop.f32.mrb[3].mxu0  ;;  %v1598_v40 = vpop.f32.mrb[3].mxu1  ;;  %v1791_v39 = vld [vmem:[%s2151_s5 + $0x90] sm:$0xff]  }
  0xeb   : > { %v1790_v38 = vld [vmem:[%s2151_s5 + $0x88] sm:$0xff]   ;;  %v1792_v40 = vld [vmem:[%s2151_s5 + $0x98] sm:$0xff]  }
  0xf3   : > { %v559_v41 = vpop.f32.mrb[4].mxu0 }
  0xf4   : > { %v565_v43 = vadd.f32 %v559_v41, %v492_v35  ;;  %v1607_v44 = vpop.f32.mrb[5].mxu0  ;;  %v1793_v41 = vld [vmem:[%s2151_s5 + $0xa0] sm:$0xff]  }
  0xf5   : > { %v562_v45 = vpop.f32.mrb[6].mxu0  ;;  %v1796_v44 = vld [vmem:[%s2151_s5 + $0xb8] sm:$0xff]  }
  0xf6   : > { %v573_v46 = vadd.f32 %v1396_v42, %v565_v43  ;;  %v1608_v47 = vpop.f32.mrb[7].mxu0  ;;  %v1794_v42 = vld [vmem:[%s2151_s5 + $0xa8] sm:$0xff]   ;;  %v1795_v43 = vld [vmem:[%s2151_s5 + $0xb0] sm:$0xff]  }
  0xf8   : > { %v574_v48 = vmax.f32 %v573_v46, 0.0 }
  0xfa   : > { %575 = vst [vmem:[%s343_s13] sm:$0xff] %v574_v48  ;;  %577 = vst [vmem:[#allocation2 + $0x1] sm:$0xff] %v574_v48 }
 0x101   : > { %v581_v50 = vld [vmem:[#allocation2 + $0x1] ss:$2 sm:$0xf]  ;;  %v578_v51 = vld [vmem:[#allocation2] ss:$2 sm:$0xf] }
 0x102   : > { %v582_v52 = vpack.c.bf16 %v581_v50, %v581_v50  ;;  %v579_v53 = vpack.c.bf16 %v578_v51, %v578_v51  ;;  %v584_v61 = vld [vmem:[#allocation2 + $0x2] ss:$2 sm:$0xf] }
 0x103   : > { %v585_v62 = vpack.c.bf16 %v584_v61, %v584_v61 }
 0x104   : > { %1626 = vmatmul.mubr.bf16.vlgmr.msra.gmra.mrb[4].mxu1 %v582_v52  ;;  %1646 = vmatmul.mubr.bf16.vlgmr.msra.gmra.mrb[8].mxu0 %v579_v53 }
 0x105   : > { %1650 = vmatpush3.bf16.msra.mxu1 %v1765_v49  ;;  %1665 = vmatprep.mubr.msk.bf16.mxu1 %vm1806_vm0, %v1805_v1 }
 0x106   : > { %1651 = vmatprep.subr.bf16.mxu1 %v1805_v1  ;;  %1685 = vmatprep.mubr.msk.bf16.mxu0 %vm1806_vm0, %v1805_v1 }
 0x107   : > { %1670 = vmatpush3.bf16.msra.mxu0 %v1773_v63 }
 0x108   : > { %1671 = vmatprep.subr.bf16.mxu0 %v1805_v1 }
 0x109   : > { %1652 = vmatpush3.bf16.msra.mxu1 %v1766_v54 }
 0x10a   : > { %1653 = vmatprep.subr.bf16.mxu1 %v1805_v1 }
 0x10b   : > { %1672 = vmatpush3.bf16.msra.mxu0 %v1775_v2 }
 0x10c   : > { %1673 = vmatprep.subr.bf16.mxu0 %v1805_v1 }
 0x10d   : > { %1654 = vmatpush3.bf16.msra.mxu1 %v1767_v55 }
 0x10e   : > { %1655 = vmatprep.subr.bf16.mxu1 %v1805_v1 }
 0x10f   : > { %1674 = vmatpush3.bf16.msra.mxu0 %v1777_v4 }
 0x110   : > { %1675 = vmatprep.subr.bf16.mxu0 %v1805_v1 }
 0x111   : > { %1656 = vmatpush3.bf16.msra.mxu1 %v1768_v56 }
 0x112   : > { %1657 = vmatprep.subr.bf16.mxu1 %v1805_v1 }
 0x113   : > { %1676 = vmatpush3.bf16.msra.mxu0 %v1779_v6 }
 0x114   : > { %1677 = vmatprep.subr.bf16.mxu0 %v1805_v1 }
 0x115   : > { %1658 = vmatpush3.bf16.msra.mxu1 %v1769_v57  ;;  %v1510_v57 = vld [vmem:[%s2152_s6] ss:$0 sm:$0xff] }
 0x116   : > { %1659 = vmatprep.subr.bf16.mxu1 %v1805_v1 }
 0x117   : > { %1678 = vmatpush3.bf16.msra.mxu0 %v1781_v8 }
 0x118   : > { %1679 = vmatprep.subr.bf16.mxu0 %v1805_v1 }
 0x119   : > { %1660 = vmatpush3.bf16.msra.mxu1 %v1770_v58 }
 0x11a   : > { %1661 = vmatprep.subr.bf16.mxu1 %v1805_v1 }
 0x11b   : > { %1680 = vmatpush3.bf16.msra.mxu0 %v1783_v10 }
 0x11c   : > { %1681 = vmatprep.subr.bf16.mxu0 %v1805_v1 }
 0x11d   : > { %1662 = vmatpush3.bf16.msra.mxu1 %v1771_v59 }
 0x11e   : > { %1663 = vmatprep.subr.bf16.mxu1 %v1805_v1 }
 0x11f   : > { %1682 = vmatpush3.bf16.msra.mxu0 %v1785_v12 }
 0x120   : > { %1683 = vmatprep.subr.bf16.mxu0 %v1805_v1 }
 0x121   : > { %1664 = vmatpush3.bf16.msra.mxu1 %v1772_v60 }
 0x122   : > { %1689 = vmatprep.subr.bf16.mxu1 %v1805_v1 }
 0x123   : > { %1684 = vmatpush3.bf16.msra.mxu0 %v1787_v14 }
 0x124   : > { %1666 = vmatmul.mubr.bf16.vlgmr.msra.gmra.mrb[8].mxu1 %v585_v62  ;;  %1709 = vmatprep.subr.bf16.mxu0 %v1805_v1 }
 0x125   : > { %1705 = vmatprep.mubr.msk.bf16.mxu1 %vm1806_vm0, %v1805_v1  ;;  %1690 = vmatpush3.bf16.msra.mxu1 %v1774_v0 }
 0x126   : > { %1691 = vmatprep.subr.bf16.mxu1 %v1805_v1 }
 0x129   : > { %1692 = vmatpush3.bf16.msra.mxu1 %v1776_v3 }
 0x12a   : > { %1693 = vmatprep.subr.bf16.mxu1 %v1805_v1 }
 0x12d   : > { %1694 = vmatpush3.bf16.msra.mxu1 %v1778_v5 }
 0x12e   : > { %1695 = vmatprep.subr.bf16.mxu1 %v1805_v1 }
 0x131   : > { %1696 = vmatpush3.bf16.msra.mxu1 %v1780_v7 }
 0x132   : > { %1697 = vmatprep.subr.bf16.mxu1 %v1805_v1 }
 0x135   : > { %1698 = vmatpush3.bf16.msra.mxu1 %v1782_v9 }
 0x136   : > { %1699 = vmatprep.subr.bf16.mxu1 %v1805_v1 }
 0x139   : > { %1700 = vmatpush3.bf16.msra.mxu1 %v1784_v11 }
 0x13a   : > { %1701 = vmatprep.subr.bf16.mxu1 %v1805_v1 }
 0x13d   : > { %1702 = vmatpush3.bf16.msra.mxu1 %v1786_v13 }
 0x13e   : > { %1703 = vmatprep.subr.bf16.mxu1 %v1805_v1 }
 0x141   : > { %1704 = vmatpush3.bf16.msra.mxu1 %v1788_v15 }
 0x1d7   : > { %v701_v16 = vpop.f32.mrb[4].mxu1  ;;  %v789_v17 = vpop.f32.mrb[8].mxu0 }
 0x1d8   : > { %v790_v18 = vadd.f32 %v789_v17, %v701_v16  ;;  %v1627_v19 = vpop.f32.mrb[5].mxu1  ;;  %v1647_v20 = vpop.f32.mrb[9].mxu0 }
 0x1d9   : > { %v704_v21 = vpop.f32.mrb[6].mxu1  ;;  %v792_v22 = vpop.f32.mrb[10].mxu0 }
 0x1da   : > { %v1628_v23 = vpop.f32.mrb[7].mxu1  ;;  %v1648_v24 = vpop.f32.mrb[11].mxu0 }
 0x1f7   : > { %v894_v25 = vpop.f32.mrb[8].mxu1 }
 0x1f8   : > { %v900_v27 = vadd.f32 %v894_v25, %v790_v18  ;;  %v1667_v28 = vpop.f32.mrb[9].mxu1 }
 0x1f9   : > { %v897_v29 = vpop.f32.mrb[10].mxu1 }
 0x1fa   : > { %v908_v30 = vadd.f32 %v1453_v26, %v900_v27  ;;  %v1668_v31 = vpop.f32.mrb[11].mxu1 }
 0x1fc   : > { %v909_v32 = vmax.f32 %v908_v30, 0.0 }
 0x1fe   : > { %910 = vst [vmem:[%s347_s29] sm:$0xf] %v909_v32  ;;  %912 = vst [vmem:[#allocation3 + $0x1] sm:$0xf] %v909_v32  ;;  %s1369_s29 = sshll.u32 %s2157_s10, 1 }
 0x1ff   : > { %s351_s13 = scalar_lea.vmem %s2155_s9, %s1369_s29 }
 0x205   : > { %v916_v34 = vld [vmem:[#allocation3 + $0x1] ss:$2 sm:$0x3]  ;;  %v913_v35 = vld [vmem:[#allocation3] ss:$2 sm:$0x3] }
 0x206   : > { %v917_v36 = vpack.c.bf16 %v916_v34, %v916_v34  ;;  %v914_v37 = vpack.c.bf16 %v913_v35, %v913_v35  ;;  %v919_v45 = vld [vmem:[#allocation3 + $0x2] ss:$2 sm:$0x3] }
 0x207   : > { %v920_v46 = vpack.c.bf16 %v919_v45, %v919_v45 }
 0x208   : > { %1686 = vmatmul.mubr.bf16.vlgmr.msra.gmra.mrb[12].mxu0 %v917_v36  ;;  %1706 = vmatmul.mubr.bf16.vlgmr.msra.gmra.mrb[12].mxu1 %v914_v37 }
 0x209   : > { %1710 = vmatpush3.bf16.msra.mxu0 %v1789_v33  ;;  %1725 = vmatprep.mubr.msk.bf16.mxu0 %vm1806_vm0, %v1805_v1 }
 0x20a   : > { %1711 = vmatprep.subr.bf16.mxu0 %v1805_v1 }
 0x20d   : > { %1712 = vmatpush3.bf16.msra.mxu0 %v1790_v38 }
 0x20e   : > { %1713 = vmatprep.subr.bf16.mxu0 %v1805_v1 }
 0x211   : > { %1714 = vmatpush3.bf16.msra.mxu0 %v1791_v39 }
 0x212   : > { %1715 = vmatprep.subr.bf16.mxu0 %v1805_v1 }
 0x215   : > { %1716 = vmatpush3.bf16.msra.mxu0 %v1792_v40 }
 0x216   : > { %1717 = vmatprep.subr.bf16.mxu0 %v1805_v1 }
 0x219   : > { %1718 = vmatpush3.bf16.msra.mxu0 %v1793_v41 }
 0x21a   : > { %1719 = vmatprep.subr.bf16.mxu0 %v1805_v1 }
 0x21d   : > { %1720 = vmatpush3.bf16.msra.mxu0 %v1794_v42 }
 0x21e   : > { %1721 = vmatprep.subr.bf16.mxu0 %v1805_v1 }
 0x221   : > { %1722 = vmatpush3.bf16.msra.mxu0 %v1795_v43 }
 0x222   : > { %1723 = vmatprep.subr.bf16.mxu0 %v1805_v1 }
 0x225   : > { %1724 = vmatpush3.bf16.msra.mxu0 %v1796_v44 }
 0x228   : > { %1726 = vmatmul.mubr.bf16.vlgmr.msra.gmra.mrb[16].mxu0 %v920_v46 }
 0x2db   : > { %v1036_v47 = vpop.f32.mrb[12].mxu0  ;;  %v1124_v48 = vpop.f32.mrb[12].mxu1 }
 0x2dc   : > { %v1125_v49 = vadd.f32 %v1124_v48, %v1036_v47  ;;  %v1687_v50 = vpop.f32.mrb[13].mxu0  ;;  %v1707_v51 = vpop.f32.mrb[13].mxu1 }
 0x2dd   : > { %v1039_v52 = vpop.f32.mrb[14].mxu0  ;;  %v1127_v53 = vpop.f32.mrb[14].mxu1 }
 0x2de   : > { %v1688_v54 = vpop.f32.mrb[15].mxu0  ;;  %v1708_v55 = vpop.f32.mrb[15].mxu1 }
 0x2fb   : > { %v1229_v56 = vpop.f32.mrb[16].mxu0 }
 0x2fc   : > { %v1235_v1 = vadd.f32 %v1229_v56, %v1125_v49  ;;  %v1727_v58 = vpop.f32.mrb[17].mxu0 }
 0x2fd   : > { %v1232_v59 = vpop.f32.mrb[18].mxu0 }
 0x2fe   : > { %v1243_v60 = vadd.f32 %v1510_v57, %v1235_v1  ;;  %v1728_v61 = vpop.f32.mrb[19].mxu0 }
 0x300   : > { %v1244_v62 = vmax.f32 %v1243_v60, 0.0 }
 0x302   : > { %1245 = vst [vmem:[%s351_s13] sm:$0x3] %v1244_v62 }
 0x303 PF: > { %s20_s30 = sadd.s32 1, %s1803_s30  }
 0x304   : > { %p17_p4 = scmp.ge.s32.totalorder %s20_s30, 4  }
 0x306   :  { %19 = sbr.rel (!%p17_p4) target bundleno = 1 (0x1), region = 114 }

</bundles_post_ra>
